<compile_context>
chip_gen: v6e
topology: v6e:2x2x1
jax: 0.10.0
libtpu: 0.0.40
codegen_flags: <defaults>
</compile_context>

<pallas_src>
import functools

import jax
import jax.numpy as jnp
from jax import lax
from jax.experimental import pallas as pl
from jax.experimental.pallas import tpu as pltpu

LANE = 128


def _round_up(x, m):
    return ((x + m - 1) // m) * m


def _conv_block_kernel(x_ref, w1_ref, b1_ref, w2_ref, b2_ref,
                       gamma_ref, beta_ref, out_ref,
                       hstk_ref, xstk_ref=None, *,
                       k, length, lpad, pad_left, res, use_im2col, eps):
    L, Lp = length, lpad
    cout = out_ref.shape[1]
    f32 = jnp.float32
    cdt = hstk_ref.dtype

    b1f = b1_ref[...].astype(f32)            # (cout, 1)
    b2f = b2_ref[...].astype(f32)

    def write_taps(dst_ref, src, rows, src_len):
        # dst_ref[t*rows + c, j] = src[c, j + t - pad_left], zero where the source
        # column falls outside [0, src_len).  All slice bounds are static ints, so
        # the only non-dense stores are tiny (<k) column edge strips per tap.
        for t in range(k):
            delta = t - pad_left
            r0 = t * rows
            lo = min(max(0, -delta), Lp)
            hi = min(max(lo, min(Lp, src_len - delta)), Lp)
            if hi > lo:
                dst_ref[r0:r0 + rows, lo:hi] = \
                    src[:, lo + delta:hi + delta].astype(cdt)
            if lo > 0:
                dst_ref[r0:r0 + rows, 0:lo] = jnp.zeros((rows, lo), cdt)
            if hi < Lp:
                dst_ref[r0:r0 + rows, hi:Lp] = jnp.zeros((rows, Lp - hi), cdt)

    # ---------------- conv1 ('same') + ReLU: one deep matmul ----------------
    if use_im2col:
        # x_ref block: (1, K*Cin, Lp) -- shifted windows stacked wrapper-side.
        x_stk = x_ref[0]
    else:
        # x_ref block: (1, Cin, L); stack the K shifted windows in VMEM.
        write_taps(xstk_ref, x_ref[0], x_ref.shape[1], L)
        x_stk = xstk_ref[...]
    acc1 = jnp.dot(w1_ref[...], x_stk, preferred_element_type=f32) + b1f
    h = jnp.maximum(acc1, 0.0)               # (cout, Lp) f32

    # dropout: identity (inference / eval semantics)
    # TODO(synk): training-mode dropout mask not implemented.

    # ---------------- conv2 ('same') + ReLU: one deep matmul ----------------
    # write_taps uses src_len=L, so the lane-padding columns of h (which only hold
    # relu(b1)) never reach the stacked operand -- no extra masking pass needed, and
    # the k-tap accumulation happens entirely inside the MXU.
    write_taps(hstk_ref, h, cout, L)
    acc2 = jnp.dot(w2_ref[...], hstk_ref[...], preferred_element_type=f32) + b2f
    y = jnp.maximum(acc2, 0.0)[:, :L]        # keep only the valid columns from here on

    # ---------------- residual (in_dim == out_dim) ----------------
    if res:
        y = y + x_ref[0].astype(f32)         # f32 input, not a bf16 staging copy

    # ---------------- LayerNorm over the (Cout, L) slab ----------------
    # Single-pass stats: lane-reduce y and y*y back-to-back while the slab is hot,
    # finish on the tiny (cout, 1) partials.  E[y^2]-mean^2 is clamped >= 0 (see
    # review note: precision is adequate at the stated tolerances).
    inv_n = 1.0 / float(cout * L)
    s1 = jnp.sum(y, axis=1, keepdims=True)
    s2 = jnp.sum(y * y, axis=1, keepdims=True)
    mean = jnp.sum(s1) * inv_n
    var = jnp.maximum(jnp.sum(s2) * inv_n - mean * mean, 0.0)
    inv_std = lax.rsqrt(var + eps)
    out = (y - mean) * inv_std * gamma_ref[...].astype(f32) + beta_ref[...].astype(f32)
    out_ref[0] = out.astype(out_ref.dtype)


def epcot_conv_block(x, w1, b1, w2, b2, gamma, beta, *, kernel_size,
                     eps=1e-5, compute_dtype=jnp.bfloat16):
    """EPCOTConvBlock forward (eval mode).

    x     : (B, Cin, L) float32
    w1    : (Cout, Cin, K)  conv1 weight (PyTorch nn.Conv1d layout)
    b1    : (Cout,)
    w2    : (Cout, Cout, K) conv2 weight
    b2    : (Cout,)
    gamma : (Cout, L)  LayerNorm weight      beta: (Cout, L)  LayerNorm bias
    """
    B, cin, L = x.shape
    k = int(kernel_size)
    cout = w1.shape[0]
    assert w1.shape == (cout, cin, k) and w2.shape == (cout, cout, k)
    assert b1.shape == (cout,) and b2.shape == (cout,)
    assert gamma.shape == (cout, L) and beta.shape == (cout, L)
    assert 1 <= k <= 255
    res = (cin == cout)

    total_pad = k - 1
    pad_left = total_pad // 2
    pad_right = total_pad - pad_left

    Lp = _round_up(L, LANE)            # lane-dense working length for the conv slabs
    cdt = jnp.dtype(compute_dtype)

    # conv1 strategy: tiny-Cin first block -> im2col stack built wrapper-side (only
    # K*Cin small rows of extra HBM traffic); residual / large-Cin blocks -> stack
    # in-kernel from the raw (Cin, L) input (no K-fold HBM blow-up).
    use_im2col = (not res) and (k * cin <= 256)

    b1c = b1.reshape(cout, 1).astype(jnp.float32)
    b2c = b2.reshape(cout, 1).astype(jnp.float32)
    # Stacked conv weights: stacked-operand row t*C + c holds channel c shifted by
    # (t - pad_left), so stacked-weight column t*C + c must be w[:, c, t].
    w1stk = jnp.transpose(w1, (0, 2, 1)).reshape(cout, k * cin).astype(cdt)
    w2stk = jnp.transpose(w2, (0, 2, 1)).reshape(cout, k * cout).astype(cdt)
    gamma_c = gamma.astype(cdt)        # affine params travel in compute dtype
    beta_c = beta.astype(cdt)

    if use_im2col:
        # Stacked/shifted input: row (t*Cin+i), col j = x[i, j + t - pad_left] (0 OOB).
        xp = jnp.pad(x, ((0, 0), (0, 0), (pad_left, (Lp - L) + pad_right)))
        xin = jnp.stack([xp[:, :, t:t + Lp] for t in range(k)], axis=1)
        xin = xin.reshape(B, k * cin, Lp).astype(cdt)
        x_spec = pl.BlockSpec((1, k * cin, Lp), lambda bb: (bb, 0, 0))
        scratch = [pltpu.VMEM((k * cout, Lp), cdt)]              # stacked conv2 operand
    else:
        xin = x
        x_spec = pl.BlockSpec((1, cin, L), lambda bb: (bb, 0, 0))
        scratch = [pltpu.VMEM((k * cout, Lp), cdt),              # stacked conv2 operand
                   pltpu.VMEM((k * cin, Lp), cdt)]               # stacked conv1 operand

    # --- explicit VMEM budget, clamped to the device's real capacity ---
    def nbytes(shape, dtype):
        n = 1
        for d in shape:
            n *= int(d)
        return n * jnp.dtype(dtype).itemsize

    scratch_bytes = nbytes((k * cout, Lp), cdt)
    if not use_im2col:
        scratch_bytes += nbytes((k * cin, Lp), cdt)
    block_bytes = (nbytes(xin.shape[1:], xin.dtype)              # input block
                   + nbytes((cout, L), x.dtype)                  # output block
                   + nbytes(w1stk.shape, cdt) + nbytes(w2stk.shape, cdt)
                   + 2 * nbytes((cout, 1), jnp.float32)
                   + 2 * nbytes((cout, L), cdt))
    temp_bytes = 4 * nbytes((cout, Lp), jnp.float32)             # acc1/h, acc2, y, out
    est = 2 * block_bytes + scratch_bytes + temp_bytes + (2 << 20)
    try:
        cap = int(getattr(pltpu.get_tpu_info(), "vmem_capacity_bytes", 64 << 20))
    except Exception:                  # conservative fallback = v7x per-TC size
        cap = 64 << 20
    vmem_limit = int(min(max(est, 16 << 20), cap - (8 << 20)))

    kern = functools.partial(
        _conv_block_kernel, k=k, length=L, lpad=Lp, pad_left=pad_left,
        res=res, use_im2col=use_im2col, eps=eps)

    # Note: the weight/bias/gamma/beta blocks are grid-invariant; single-buffering
    # them (pipeline_mode=pl.Buffered(1)) would shave more VMEM on v7x but is left
    # off here to keep compilation maximally portable.
    out = pl.pallas_call(
        kern,
        out_shape=jax.ShapeDtypeStruct((B, cout, L), x.dtype),
        grid=(B,),
        in_specs=[
            x_spec,
            pl.BlockSpec((cout, k * cin), lambda bb: (0, 0)),     # conv1 weight (stacked)
            pl.BlockSpec((cout, 1), lambda bb: (0, 0)),           # conv1 bias
            pl.BlockSpec((cout, k * cout), lambda bb: (0, 0)),    # conv2 weight (stacked)
            pl.BlockSpec((cout, 1), lambda bb: (0, 0)),           # conv2 bias
            pl.BlockSpec((cout, L), lambda bb: (0, 0)),           # LayerNorm gamma
            pl.BlockSpec((cout, L), lambda bb: (0, 0)),           # LayerNorm beta
        ],
        out_specs=pl.BlockSpec((1, cout, L), lambda bb: (bb, 0, 0)),
        scratch_shapes=scratch,
        compiler_params=pltpu.CompilerParams(
            dimension_semantics=("parallel",),
            vmem_limit_bytes=vmem_limit),
    )(xin, w1stk, b1c, w2stk, b2c, gamma_c, beta_c)
    return out


def reference(x, w1, b1, w2, b2, gamma, beta, *, kernel_size, eps=1e-5):
    """Pure-JAX f32 reference of the same forward pass (eval-mode dropout)."""
    k = kernel_size
    pad_left = (k - 1) // 2
    pad_right = (k - 1) - pad_left

    def conv_same(inp, w, b):
        L = inp.shape[2]
        xp = jnp.pad(inp, ((0, 0), (0, 0), (pad_left, pad_right)))
        out = jnp.zeros((inp.shape[0], w.shape[0], L), jnp.float32)
        for t in range(k):
            out = out + jnp.einsum('oi,bil->bol', w[:, :, t], xp[:, :, t:t + L],
                                   precision=lax.Precision.HIGHEST)
        return out + b[None, :, None]

    h = jnp.maximum(conv_same(x, w1, b1), 0.0)
    y = jnp.maximum(conv_same(h, w2, b2), 0.0)
    if x.shape[1] == w1.shape[0]:
        y = y + x
    mean = jnp.mean(y, axis=(1, 2), keepdims=True)
    var = jnp.mean((y - mean) ** 2, axis=(1, 2), keepdims=True)
    return (y - mean) / jnp.sqrt(var + eps) * gamma[None] + beta[None]


if __name__ == "__main__":
    B, L, K = 2, 16, 5

    def make_params(key, cin, cout):
        k1, kb1, k2, kb2, kg, kb = jax.random.split(key, 6)
        w1 = jax.random.normal(k1, (cout, cin, K), jnp.float32) / (cin * K) ** 0.5
        b1 = 0.1 * jax.random.normal(kb1, (cout,), jnp.float32)
        w2 = jax.random.normal(k2, (cout, cout, K), jnp.float32) / (cout * K) ** 0.5
        b2 = 0.1 * jax.random.normal(kb2, (cout,), jnp.float32)
        gamma = 1.0 + 0.1 * jax.random.normal(kg, (cout, L), jnp.float32)
        beta = 0.1 * jax.random.normal(kb, (cout, L), jnp.float32)
        return w1, b1, w2, b2, gamma, beta

    root = jax.random.PRNGKey(0)
    kx1, kp1, kx2, kp2 = jax.random.split(root, 4)

    # Case 1: first-block shape (in_dim != out_dim) -> im2col conv1 path, no residual.
    x1 = jax.random.normal(kx1, (B, 4, L), jnp.float32)
    p1 = make_params(kp1, 4, 16)
    # Case 2: residual block (in_dim == out_dim) -> in-kernel tap stacking + residual.
    x2 = jax.random.normal(kx2, (B, 16, L), jnp.float32)
    p2 = make_params(kp2, 16, 16)

    for x, params in ((x1, p1), (x2, p2)):
        ref = reference(x, *params, kernel_size=K)
        for dt, atol, rtol in ((jnp.float32, 2e-3, 2e-3), (jnp.bfloat16, 5e-2, 5e-2)):
            run = jax.jit(functools.partial(epcot_conv_block, kernel_size=K,
                                            compute_dtype=dt))
            out = jax.block_until_ready(run(x, *params))
            assert out.shape == ref.shape
            err = float(jnp.max(jnp.abs(out - ref)))
            assert jnp.allclose(out, ref, atol=atol, rtol=rtol), (str(dt), err)

    print("KERNEL_OK")
</pallas_src>

<mosaic_0001>
module attributes {stable_mosaic.version = 11 : i64} {
  func.func @_conv_block_kernel(%arg0: i32, %arg1: memref<1x20x128xf32, #tpu.memory_space<vmem>>, %arg2: memref<16x20xf32, #tpu.memory_space<vmem>>, %arg3: memref<16x1xf32, #tpu.memory_space<vmem>>, %arg4: memref<16x80xf32, #tpu.memory_space<vmem>>, %arg5: memref<16x1xf32, #tpu.memory_space<vmem>>, %arg6: memref<16x16xf32, #tpu.memory_space<vmem>>, %arg7: memref<16x16xf32, #tpu.memory_space<vmem>>, %arg8: memref<1x16x16xf32, #tpu.memory_space<vmem>>, %arg9: memref<80x128xf32, #tpu.memory_space<vmem>>) attributes {dimension_semantics = [#tpu.dimension_semantics<parallel>], iteration_bounds = array<i64: 2>, scalar_prefetch = 0 : i64, scratch_operands = 1 : i64, tpu.core_type = #tpu.core_type<tc>, window_params = [{transform_indices = @transform_0, window_bounds = array<i64: 1, 20, 128>}, {pipeline_mode = #tpu.pipeline_mode<synchronous>, transform_indices = @transform_1, window_bounds = array<i64: 16, 20>}, {pipeline_mode = #tpu.pipeline_mode<synchronous>, transform_indices = @transform_2, window_bounds = array<i64: 16, 1>}, {pipeline_mode = #tpu.pipeline_mode<synchronous>, transform_indices = @transform_3, window_bounds = array<i64: 16, 80>}, {pipeline_mode = #tpu.pipeline_mode<synchronous>, transform_indices = @transform_4, window_bounds = array<i64: 16, 1>}, {pipeline_mode = #tpu.pipeline_mode<synchronous>, transform_indices = @transform_5, window_bounds = array<i64: 16, 16>}, {pipeline_mode = #tpu.pipeline_mode<synchronous>, transform_indices = @transform_6, window_bounds = array<i64: 16, 16>}, {transform_indices = @transform_7, window_bounds = array<i64: 1, 16, 16>}]} {
    %c0 = arith.constant 0 : index
    %c0_0 = arith.constant 0 : index
    %0 = vector.load %arg3[%c0, %c0_0] : memref<16x1xf32, #tpu.memory_space<vmem>>, vector<16x1xf32>
    %c0_1 = arith.constant 0 : index
    %c0_2 = arith.constant 0 : index
    %1 = vector.load %arg5[%c0_1, %c0_2] : memref<16x1xf32, #tpu.memory_space<vmem>>, vector<16x1xf32>
    %c0_3 = arith.constant 0 : index
    %c0_4 = arith.constant 0 : index
    %c0_5 = arith.constant 0 : index
    %2 = vector.load %arg1[%c0_3, %c0_4, %c0_5] : memref<1x20x128xf32, #tpu.memory_space<vmem>>, vector<1x20x128xf32>
    %3 = vector.shape_cast %2 : vector<1x20x128xf32> to vector<20x128xf32>
    %c0_6 = arith.constant 0 : index
    %c0_7 = arith.constant 0 : index
    %4 = vector.load %arg2[%c0_6, %c0_7] : memref<16x20xf32, #tpu.memory_space<vmem>>, vector<16x20xf32>
    %cst = arith.constant dense<0.000000e+00> : vector<16x128xf32>
    %5 = tpu.matmul %4, %3, %cst {dimension_numbers = #tpu.dot_dimension_numbers<[1], [0], [0], [1], [0, 0, 1, 1], [], []>} : vector<16x20xf32>, vector<20x128xf32>, vector<16x128xf32> -> vector<16x128xf32>
    %6 = vector.broadcast %0 : vector<16x1xf32> to vector<16x128xf32>
    %7 = arith.addf %5, %6 : vector<16x128xf32>
    %cst_8 = arith.constant 0.000000e+00 : f32
    %8 = vector.broadcast %cst_8 : f32 to vector<16x128xf32>
    %9 = arith.maximumf %7, %8 : vector<16x128xf32>
    %10 = vector.extract_strided_slice %9 {offsets = [0, 0], sizes = [16, 16], strides = [1, 1]} : vector<16x128xf32> to vector<16x16xf32>
    %c0_9 = arith.constant 0 : index
    %c2 = arith.constant 2 : index
    %11 = vector.load %arg9[%c0_9, %c2] : memref<80x128xf32, #tpu.memory_space<vmem>>, vector<16x16xf32>
    tpu.vector_store %arg9[%c0_9, %c2], %10 {strides = array<i32>} : memref<80x128xf32, #tpu.memory_space<vmem>>, vector<16x16xf32>,
    %cst_10 = arith.constant 0.000000e+00 : f32
    %12 = vector.broadcast %cst_10 : f32 to vector<16x2xf32>
    %c0_11 = arith.constant 0 : index
    %c0_12 = arith.constant 0 : index
    %13 = vector.load %arg9[%c0_11, %c0_12] : memref<80x128xf32, #tpu.memory_space<vmem>>, vector<16x2xf32>
    tpu.vector_store %arg9[%c0_11, %c0_12], %12 {strides = array<i32>} : memref<80x128xf32, #tpu.memory_space<vmem>>, vector<16x2xf32>,
    %cst_13 = arith.constant 0.000000e+00 : f32
    %14 = vector.broadcast %cst_13 : f32 to vector<16x110xf32>
    %c0_14 = arith.constant 0 : index
    %c18 = arith.constant 18 : index
    %15 = vector.load %arg9[%c0_14, %c18] : memref<80x128xf32, #tpu.memory_space<vmem>>, vector<16x110xf32>
    tpu.vector_store %arg9[%c0_14, %c18], %14 {strides = array<i32>} : memref<80x128xf32, #tpu.memory_space<vmem>>, vector<16x110xf32>,
    %16 = vector.extract_strided_slice %9 {offsets = [0, 0], sizes = [16, 16], strides = [1, 1]} : vector<16x128xf32> to vector<16x16xf32>
    %c16 = arith.constant 16 : index
    %c1 = arith.constant 1 : index
    %17 = vector.load %arg9[%c16, %c1] : memref<80x128xf32, #tpu.memory_space<vmem>>, vector<16x16xf32>
    tpu.vector_store %arg9[%c16, %c1], %16 {strides = array<i32>} : memref<80x128xf32, #tpu.memory_space<vmem>>, vector<16x16xf32>,
    %cst_15 = arith.constant 0.000000e+00 : f32
    %18 = vector.broadcast %cst_15 : f32 to vector<16x1xf32>
    %c16_16 = arith.constant 16 : index
    %c0_17 = arith.constant 0 : index
    %19 = vector.load %arg9[%c16_16, %c0_17] : memref<80x128xf32, #tpu.memory_space<vmem>>, vector<16x1xf32>
    tpu.vector_store %arg9[%c16_16, %c0_17], %18 {strides = array<i32>} : memref<80x128xf32, #tpu.memory_space<vmem>>, vector<16x1xf32>,
    %cst_18 = arith.constant 0.000000e+00 : f32
    %20 = vector.broadcast %cst_18 : f32 to vector<16x111xf32>
    %c16_19 = arith.constant 16 : index
    %c17 = arith.constant 17 : index
    %21 = vector.load %arg9[%c16_19, %c17] : memref<80x128xf32, #tpu.memory_space<vmem>>, vector<16x111xf32>
    tpu.vector_store %arg9[%c16_19, %c17], %20 {strides = array<i32>} : memref<80x128xf32, #tpu.memory_space<vmem>>, vector<16x111xf32>,
    %22 = vector.extract_strided_slice %9 {offsets = [0, 0], sizes = [16, 16], strides = [1, 1]} : vector<16x128xf32> to vector<16x16xf32>
    %c32 = arith.constant 32 : index
    %c0_20 = arith.constant 0 : index
    %23 = vector.load %arg9[%c32, %c0_20] : memref<80x128xf32, #tpu.memory_space<vmem>>, vector<16x16xf32>
    tpu.vector_store %arg9[%c32, %c0_20], %22 {strides = array<i32>} : memref<80x128xf32, #tpu.memory_space<vmem>>, vector<16x16xf32>,
    %cst_21 = arith.constant 0.000000e+00 : f32
    %24 = vector.broadcast %cst_21 : f32 to vector<16x112xf32>
    %c32_22 = arith.constant 32 : index
    %c16_23 = arith.constant 16 : index
    %25 = vector.load %arg9[%c32_22, %c16_23] : memref<80x128xf32, #tpu.memory_space<vmem>>, vector<16x112xf32>
    tpu.vector_store %arg9[%c32_22, %c16_23], %24 {strides = array<i32>} : memref<80x128xf32, #tpu.memory_space<vmem>>, vector<16x112xf32>,
    %26 = vector.extract_strided_slice %9 {offsets = [0, 1], sizes = [16, 15], strides = [1, 1]} : vector<16x128xf32> to vector<16x15xf32>
    %c48 = arith.constant 48 : index
    %c0_24 = arith.constant 0 : index
    %27 = vector.load %arg9[%c48, %c0_24] : memref<80x128xf32, #tpu.memory_space<vmem>>, vector<16x15xf32>
    tpu.vector_store %arg9[%c48, %c0_24], %26 {strides = array<i32>} : memref<80x128xf32, #tpu.memory_space<vmem>>, vector<16x15xf32>,
    %cst_25 = arith.constant 0.000000e+00 : f32
    %28 = vector.broadcast %cst_25 : f32 to vector<16x113xf32>
    %c48_26 = arith.constant 48 : index
    %c15 = arith.constant 15 : index
    %29 = vector.load %arg9[%c48_26, %c15] : memref<80x128xf32, #tpu.memory_space<vmem>>, vector<16x113xf32>
    tpu.vector_store %arg9[%c48_26, %c15], %28 {strides = array<i32>} : memref<80x128xf32, #tpu.memory_space<vmem>>, vector<16x113xf32>,
    %30 = vector.extract_strided_slice %9 {offsets = [0, 2], sizes = [16, 14], strides = [1, 1]} : vector<16x128xf32> to vector<16x14xf32>
    %c64 = arith.constant 64 : index
    %c0_27 = arith.constant 0 : index
    %31 = vector.load %arg9[%c64, %c0_27] : memref<80x128xf32, #tpu.memory_space<vmem>>, vector<16x14xf32>
    tpu.vector_store %arg9[%c64, %c0_27], %30 {strides = array<i32>} : memref<80x128xf32, #tpu.memory_space<vmem>>, vector<16x14xf32>,
    %cst_28 = arith.constant 0.000000e+00 : f32
    %32 = vector.broadcast %cst_28 : f32 to vector<16x114xf32>
    %c64_29 = arith.constant 64 : index
    %c14 = arith.constant 14 : index
    %33 = vector.load %arg9[%c64_29, %c14] : memref<80x128xf32, #tpu.memory_space<vmem>>, vector<16x114xf32>
    tpu.vector_store %arg9[%c64_29, %c14], %32 {strides = array<i32>} : memref<80x128xf32, #tpu.memory_space<vmem>>, vector<16x114xf32>,
    %c0_30 = arith.constant 0 : index
    %c0_31 = arith.constant 0 : index
    %34 = vector.load %arg4[%c0_30, %c0_31] : memref<16x80xf32, #tpu.memory_space<vmem>>, vector<16x80xf32>
    %c0_32 = arith.constant 0 : index
    %c0_33 = arith.constant 0 : index
    %35 = vector.load %arg9[%c0_32, %c0_33] : memref<80x128xf32, #tpu.memory_space<vmem>>, vector<80x128xf32>
    %cst_34 = arith.constant dense<0.000000e+00> : vector<16x128xf32>
    %36 = tpu.matmul %34, %35, %cst_34 {dimension_numbers = #tpu.dot_dimension_numbers<[1], [0], [0], [1], [0, 0, 1, 1], [], []>} : vector<16x80xf32>, vector<80x128xf32>, vector<16x128xf32> -> vector<16x128xf32>
    %37 = vector.broadcast %1 : vector<16x1xf32> to vector<16x128xf32>
    %38 = arith.addf %36, %37 : vector<16x128xf32>
    %cst_35 = arith.constant 0.000000e+00 : f32
    %39 = vector.broadcast %cst_35 : f32 to vector<16x128xf32>
    %40 = arith.maximumf %38, %39 : vector<16x128xf32>
    %41 = vector.extract_strided_slice %40 {offsets = [0, 0], sizes = [16, 16], strides = [1, 1]} : vector<16x128xf32> to vector<16x16xf32>
    %cst_36 = arith.constant dense<0.000000e+00> : vector<16xf32>
    %42 = vector.multi_reduction <add>, %41, %cst_36 [1] : vector<16x16xf32> to vector<16xf32>
    %43 = vector.shape_cast %42 : vector<16xf32> to vector<16x1xf32>
    %44 = arith.mulf %41, %41 : vector<16x16xf32>
    %cst_37 = arith.constant dense<0.000000e+00> : vector<16xf32>
    %45 = vector.multi_reduction <add>, %44, %cst_37 [1] : vector<16x16xf32> to vector<16xf32>
    %46 = vector.shape_cast %45 : vector<16xf32> to vector<16x1xf32>
    %47 = vector.shape_cast %43 : vector<16x1xf32> to vector<1x16x1xf32>
    %cst_38 = arith.constant dense<0.000000e+00> : vector<1xf32>
    %48 = vector.multi_reduction <add>, %47, %cst_38 [1, 2] : vector<1x16x1xf32> to vector<1xf32>
    %49 = vector.shape_cast %48 : vector<1xf32> to vector<1x1x1xf32>
    %50 = vector.extract %49[0, 0, 0] : f32 from vector<1x1x1xf32>
    %cst_39 = arith.constant 3.906250e-03 : f32
    %51 = arith.mulf %50, %cst_39 : f32
    %52 = vector.shape_cast %46 : vector<16x1xf32> to vector<1x16x1xf32>
    %cst_40 = arith.constant dense<0.000000e+00> : vector<1xf32>
    %53 = vector.multi_reduction <add>, %52, %cst_40 [1, 2] : vector<1x16x1xf32> to vector<1xf32>
    %54 = vector.shape_cast %53 : vector<1xf32> to vector<1x1x1xf32>
    %55 = vector.extract %54[0, 0, 0] : f32 from vector<1x1x1xf32>
    %cst_41 = arith.constant 3.906250e-03 : f32
    %56 = arith.mulf %55, %cst_41 : f32
    %57 = arith.mulf %51, %51 : f32
    %58 = arith.subf %56, %57 : f32
    %cst_42 = arith.constant 0.000000e+00 : f32
    %59 = arith.maximumf %58, %cst_42 : f32
    %cst_43 = arith.constant 9.99999974E-6 : f32
    %60 = arith.addf %59, %cst_43 : f32
    %61 = math.rsqrt %60 : f32
    %62 = vector.broadcast %51 : f32 to vector<16x16xf32>
    %63 = arith.subf %41, %62 : vector<16x16xf32>
    %64 = vector.broadcast %61 : f32 to vector<16x16xf32>
    %65 = arith.mulf %63, %64 : vector<16x16xf32>
    %c0_44 = arith.constant 0 : index
    %c0_45 = arith.constant 0 : index
    %66 = vector.load %arg6[%c0_44, %c0_45] : memref<16x16xf32, #tpu.memory_space<vmem>>, vector<16x16xf32>
    %67 = arith.mulf %65, %66 : vector<16x16xf32>
    %c0_46 = arith.constant 0 : index
    %c0_47 = arith.constant 0 : index
    %68 = vector.load %arg7[%c0_46, %c0_47] : memref<16x16xf32, #tpu.memory_space<vmem>>, vector<16x16xf32>
    %69 = arith.addf %67, %68 : vector<16x16xf32>
    %c0_48 = arith.constant 0 : index
    %c0_49 = arith.constant 0 : index
    %c0_50 = arith.constant 0 : index
    %70 = vector.load %arg8[%c0_48, %c0_49, %c0_50] : memref<1x16x16xf32, #tpu.memory_space<vmem>>, vector<1x16x16xf32>
    %71 = vector.shape_cast %70 : vector<1x16x16xf32> to vector<16x16xf32>
    %72 = vector.shape_cast %69 : vector<16x16xf32> to vector<1x16x16xf32>
    tpu.vector_store %arg8[%c0_48, %c0_49, %c0_50], %72 {strides = array<i32>} : memref<1x16x16xf32, #tpu.memory_space<vmem>>, vector<1x16x16xf32>,
    return
  }
  func.func @transform_0(%arg0: i32) -> (i32, i32, i32) {
    %c0_i32 = arith.constant 0 : i32
    %c0_i32_0 = arith.constant 0 : i32
    %c0_i32_1 = arith.constant 0 : i32
    return %arg0, %c0_i32, %c0_i32_0 : i32, i32, i32
  }
  func.func @transform_1(%arg0: i32) -> (i32, i32) {
    %c0_i32 = arith.constant 0 : i32
    %c0_i32_0 = arith.constant 0 : i32
    %c0_i32_1 = arith.constant 0 : i32
    return %c0_i32, %c0_i32_0 : i32, i32
  }
  func.func @transform_2(%arg0: i32) -> (i32, i32) {
    %c0_i32 = arith.constant 0 : i32
    %c0_i32_0 = arith.constant 0 : i32
    %c0_i32_1 = arith.constant 0 : i32
    return %c0_i32, %c0_i32_0 : i32, i32
  }
  func.func @transform_3(%arg0: i32) -> (i32, i32) {
    %c0_i32 = arith.constant 0 : i32
    %c0_i32_0 = arith.constant 0 : i32
    %c0_i32_1 = arith.constant 0 : i32
    return %c0_i32, %c0_i32_0 : i32, i32
  }
  func.func @transform_4(%arg0: i32) -> (i32, i32) {
    %c0_i32 = arith.constant 0 : i32
    %c0_i32_0 = arith.constant 0 : i32
    %c0_i32_1 = arith.constant 0 : i32
    return %c0_i32, %c0_i32_0 : i32, i32
  }
  func.func @transform_5(%arg0: i32) -> (i32, i32) {
    %c0_i32 = arith.constant 0 : i32
    %c0_i32_0 = arith.constant 0 : i32
    %c0_i32_1 = arith.constant 0 : i32
    return %c0_i32, %c0_i32_0 : i32, i32
  }
  func.func @transform_6(%arg0: i32) -> (i32, i32) {
    %c0_i32 = arith.constant 0 : i32
    %c0_i32_0 = arith.constant 0 : i32
    %c0_i32_1 = arith.constant 0 : i32
    return %c0_i32, %c0_i32_0 : i32, i32
  }
  func.func @transform_7(%arg0: i32) -> (i32, i32, i32) {
    %c0_i32 = arith.constant 0 : i32
    %c0_i32_0 = arith.constant 0 : i32
    %c0_i32_1 = arith.constant 0 : i32
    return %arg0, %c0_i32, %c0_i32_0 : i32, i32, i32
  }
}

</mosaic_0001>

<bundles_post_ra>
// kernel: epcot_conv_block.1
= control target key start
LH: loop header
LB: loop body
LE: loop exit
PB: predicated region body
PF: predicated region fallthrough
CT: control target
= control target key end

     0   :  { %12 = vsyncpa [#allocation4], 0  ;;  %s1112_s0 = inlined_call_operand.vmem [shape: f32[2,20,128], index: 0, kind: input, shape index: {}]   ;;  %s1113_s1 = inlined_call_operand.vmem [shape: f32[16,20], index: 1, kind: input, shape index: {}]   ;;  %s1114_s2 = inlined_call_operand.vmem [shape: f32[16,1], index: 2, kind: input, shape index: {}]   ;;  %s1115_s3 = inlined_call_operand.vmem [shape: f32[16,80], index: 3, kind: input, shape index: {}]   ;;  %s1116_s4 = inlined_call_operand.vmem [shape: f32[16,1], index: 4, kind: input, shape index: {}]   ;;  %s1117_s5 = inlined_call_operand.vmem [shape: f32[16,16], index: 5, kind: input, shape index: {}]   ;;  %s1118_s6 = inlined_call_operand.vmem [shape: f32[16,16], index: 6, kind: input, shape index: {}]   ;;  %s1119_s7 = inlined_call_operand.hbm [shape: f32[2,16,16], index: 7, kind: output, shape index: {}]  }
   0x1   :  { %14 = vsyncpa [#allocation4 + $0x1], 0  ;;  %s928_s24 = smov 0   ;;  %s930_s25 = smov 0  }
   0x2   :  { %s932_s26 = smov 0   ;;  %s934_s27 = smov 0  }
   0x3 LB: > { %s949_s28 = sadd.s32 4294967295, %s876_s27   ;;  %s691_s29 = sadd.s32 4294967294, %s876_s27   ;;  %s876_s27 = sphi %s934_s27, %s1125_s27   ;;  %s872_s26 = sphi %s932_s26, %s1124_s26   ;;  %s868_s25 = sphi %s930_s25, %s1123_s25   ;;  %s864_s24 = sphi %s928_s24, %s1122_s24  }
   0x4   : > { %s953_s30 = sadd.s32 1, %s876_s27   ;;  %s179_s8 = sadd.s32 1, %s872_s26 }
   0x5   : > { %s176_s9 = ssub.s32 %s876_s27, %s953_s30  ;;  %p189_p0 = scmp.ne.s32.totalorder %s872_s26, %s868_s25 }
   0x6   : > { %p177_p1 = scmp.eq.s32.totalorder %s176_s9, 0  ;;  %p190_p2 = scmp.eq.s32.totalorder %s949_s28, 1 }
   0x7   : > { %p195_p3 = scmp.ne.s32.totalorder %s868_s25, %s864_s24  ;;  %p196_p4 = scmp.eq.s32.totalorder %s691_s29, 1 }
   0x8   : > { %s964_s10 = scalar_select %p177_p1, %s872_s26, %s179_s8  }
   0x9   : > { %p966_p5 = por %p190_p2, %p189_p0  ;;  %p970_p6 = por %p196_p4, %p195_p3 }
   0xa   : > { %p694_p7 = scmp.ge.s32.totalorder %s876_s27, 1  ;;  %p240_p8 = scmp.lt.s32.totalorder %s876_s27, 3 }
   0xc   : > { %p241_p9 = pnand %p694_p7, %p240_p8 }
   0xd   : > { %p272_p10 = scmp.lt.s32.totalorder (!%p241_p9), %s949_s28, 1  ;;  %s879_s9 = smov (!%p241_p9), 127  }
   0xe   : > { %244 = sbr.rel (%p241_p9) target bundleno = 1019 (0x3fb), region = 48  ;;  %s880_s13 = smov (!%p241_p9), 126  }
   0xf   : > { %s882_s14 = smov (!%p241_p9), 1   ;;  %s883_s15 = smov (!%p241_p9), 2  }
  0x10   : > { %s884_s16 = smov (!%p241_p9), 0.0   ;;  %s269_s19 = sand.u32 (!%p241_p9), 1, %s868_s25  }
  0x13   : > { %v284_v0 = vld [vmem:[%s1113_s1] sm:$0xff]  ;;  %vm296_vm0 = vcmask 162816   ;;  %v878_v1 = vmov 0   ;;  %v278_v2 = vld [vmem:[%s1114_s2 + $0x8] sm:$0xff]  ;;  %s273_s17 = scalar_select %p272_p10, %s949_s28, 1  ;;  %vm303_vm1 = vcmask 1043456  }
  0x14   : > { %731 = vmatprep.mubr.msk.f32.mxu0 %vm296_vm0, %v284_v0  ;;  %812 = vset.pattern.permute.xlu0 %v878_v1  ;;  %v277_v3 = vld [vmem:[%s1114_s2] sm:$0xff]  ;;  %v285_v7 = vld [vmem:[%s1113_s1 + $0x8] sm:$0xff]  ;;  %vm416_vm2 = vcmask 130048   ;;  %vm419_vm3 = vcmask 1047680   ;;  %v881_v16 = vmov 0.0   ;;  %vm468_vm4 = vcmask 654336  }
  0x15   : > { %293 = vperm.xlu0 %812, %v278_v2   ;;  %813 = vset.pattern.permute.xlu1 %v878_v1  ;;  %s757_s20 = smul.u32 24, %s273_s17  ;;  %v279_v17 = vld [vmem:[%s1116_s4] sm:$0xff]  ;;  %v280_v19 = vld [vmem:[%s1116_s4 + $0x8] sm:$0xff]  ;;  %vm428_vm5 = vcmask 121856   ;;  %vm440_vm6 = vcmask 113664   ;;  %vm431_vm7 = vcmask 1047672  }
  0x16   : > { %v446_v18 = vld [vmem:[%s1115_s3] sm:$0xff]  ;;  %vm443_vm8 = vcmask 1047664   ;;  %vm407_vm9 = vcmask 138248   ;;  %vm410_vm10 = vcmask 7168   ;;  %vm413_vm11 = vcmask 1047688   ;;  %v447_v38 = vld [vmem:[%s1115_s3 + $0x8] sm:$0xff] }
  0x17   : > { %s276_s23 = scalar_lea.vmem %s1112_s0, %s757_s20  ;;  %754 = vmatprep.mubr.msk.f32.mxu1 %vm468_vm4, %v446_v18  ;;  %vm392_vm12 = vcmask 146448   ;;  %vm395_vm13 = vcmask 15360   ;;  %vm398_vm14 = vcmask 1047696   ;;  %s695_s20 = sshll.u32 %s269_s19, 4 }
  0x18   : > { %v283_v4 = vld [vmem:[%s276_s23 + $0x10] sm:$0xf]  ;;  %v282_v5 = vld [vmem:[%s276_s23 + $0x8] sm:$0xff]  ;;  %v281_v6 = vld [vmem:[%s276_s23] sm:$0xff] }
  0x19   : > { %288 = vperm.xlu0 %812, %v277_v3   ;;  %725 = vmatprep.subr.msk.mxu0 %vm303_vm1, %v283_v4 }
  0x1a   : > { %726 = vmatpush3.msk.msra.mxu0 %vm303_vm1, %v283_v4 }
  0x1b   : > { %727 = vmatprep.subr.mxu0 %v282_v5 }
  0x1c   : > { %728 = vmatpush3.msra.mxu0 %v282_v5 }
  0x1d   : > { %729 = vmatprep.subr.mxu0 %v281_v6 }
  0x1e   : > { %730 = vmatpush3.msra.mxu0 %v281_v6 }
  0x1f   : > { %732 = vmatmul.mubr.msk.f32.vlgmr.msra.gmra.mxu0 %vm296_vm0, %v285_v7 }
  0x90   : > { %v294_v8 = vpop.permute.xlu0 %293 }
  0x94   : > { %v289_v11 = vpop.permute.xlu0 %288 }
  0xdf   : > { %v733_v9 = vpop.f32.mrf.mxu0 }
  0xe0   : > { %v379_v10 = vadd.f32 %v733_v9, %v294_v8 }
  0xe1   : > { %v373_v12 = vpop.f32.mrf.mxu0 }
  0xe2   : > { %v383_v13 = vmax.f32 %v379_v10, 0.0  ;;  %v374_v14 = vadd.f32 %v373_v12, %v289_v11 }
  0xe4   : > { %418 = vst.msk [vmem:[#allocation2 + $0x28] sm:$0xff] %vm416_vm2, %v383_v13  ;;  %v382_v15 = vmax.f32 %v374_v14, 0.0  ;;  %424 = vrot.lane.b32.xlu0 %v383_v13, %s879_s9  ;;  %436 = vrot.lane.b32.xlu1 %v383_v13, %s880_s13 }
  0xe5   : > { %421 = vst.msk [vmem:[#allocation2 + $0x28] sm:$0xff] %vm419_vm3, %v881_v16 }
  0xe6   : > { %417 = vst.msk [vmem:[#allocation2 + $0x20] sm:$0xff] %vm416_vm2, %v382_v15 }
  0xe7   : > { %420 = vst.msk [vmem:[#allocation2 + $0x20] sm:$0xff] %vm419_vm3, %v881_v16 }
  0xe8   : > { %403 = vrot.lane.b32.xlu0 %v383_v13, %s882_s14  ;;  %434 = vrot.lane.b32.xlu1 %v382_v15, %s880_s13 }
  0xec   : > { %388 = vrot.lane.b32.xlu0 %v383_v13, %s883_s15  ;;  %422 = vrot.lane.b32.xlu1 %v382_v15, %s879_s9  ;;  %v453_v32 = vld [vmem:[#allocation2 + $0x28] sm:$0xff] }
  0xee   : > { %v452_v33 = vld [vmem:[#allocation2 + $0x20] sm:$0xff] }
  0xf0   : > { %460 = vperm.xlu0 %812, %v279_v17   ;;  %401 = vrot.lane.b32.xlu1 %v382_v15, %s882_s14 }
  0xf4   : > { %386 = vrot.lane.b32.xlu1 %v382_v15, %s883_s15 }
  0xf8   : > { %465 = vperm.xlu1 %813, %v280_v19   ;;  %v605_v19 = vld [vmem:[%s1117_s5] sm:$0xff] }
 0x156   : > { %v425_v20 = vpop.permute.xlu0 %424  ;;  %v437_v21 = vpop.permute.xlu1 %436 }
 0x157   : > { %430 = vst.msk [vmem:[#allocation2 + $0x38] sm:$0xff] %vm428_vm5, %v425_v20  ;;  %v606_v20 = vld [vmem:[%s1117_s5 + $0x8] sm:$0xff] }
 0x158   : > { %442 = vst.msk [vmem:[#allocation2 + $0x48] sm:$0xff] %vm440_vm6, %v437_v21 }
 0x159   : > { %433 = vst.msk [vmem:[#allocation2 + $0x38] sm:$0xff] %vm431_vm7, %v881_v16 }
 0x15a   : > { %445 = vst.msk [vmem:[#allocation2 + $0x48] sm:$0xff] %vm443_vm8, %v881_v16  ;;  %v404_v22 = vpop.permute.xlu0 %403  ;;  %v435_v23 = vpop.permute.xlu1 %434 }
 0x15b   : > { %409 = vst.msk [vmem:[#allocation2 + $0x18] sm:$0xff] %vm407_vm9, %v404_v22 }
 0x15c   : > { %441 = vst.msk [vmem:[#allocation2 + $0x40] sm:$0xff] %vm440_vm6, %v435_v23  ;;  %v609_v23 = vld [vmem:[%s1118_s6] sm:$0xff] }
 0x15d   : > { %412 = vst.msk [vmem:[#allocation2 + $0x18] sm:$0xff] %vm410_vm10, %v881_v16 }
 0x15e   : > { %444 = vst.msk [vmem:[#allocation2 + $0x40] sm:$0xff] %vm443_vm8, %v881_v16  ;;  %v389_v24 = vpop.permute.xlu0 %388  ;;  %v423_v25 = vpop.permute.xlu1 %422 }
 0x15f   : > { %415 = vst.msk [vmem:[#allocation2 + $0x18] sm:$0xff] %vm413_vm11, %v881_v16 }
 0x160   : > { %394 = vst.msk [vmem:[#allocation2 + $0x8] sm:$0xff] %vm392_vm12, %v389_v24  ;;  %v455_v29 = vld [vmem:[#allocation2 + $0x38] sm:$0xff]  ;;  %v610_v24 = vld [vmem:[%s1118_s6 + $0x8] sm:$0xff] }
 0x161   : > { %429 = vst.msk [vmem:[#allocation2 + $0x30] sm:$0xff] %vm428_vm5, %v423_v25  ;;  %v457_v26 = vld [vmem:[#allocation2 + $0x48] sm:$0xff] }
 0x162   : > { %397 = vst.msk [vmem:[#allocation2 + $0x8] sm:$0xff] %vm395_vm13, %v881_v16  ;;  %734 = vmatprep.subr.mxu1 %v457_v26  ;;  %v402_v27 = vpop.permute.xlu1 %401 }
 0x163   : > { %432 = vst.msk [vmem:[#allocation2 + $0x30] sm:$0xff] %vm431_vm7, %v881_v16  ;;  %735 = vmatpush3.msra.mxu1 %v457_v26 }
 0x164   : > { %400 = vst.msk [vmem:[#allocation2 + $0x8] sm:$0xff] %vm398_vm14, %v881_v16 }
 0x165   : > { %408 = vst.msk [vmem:[#allocation2 + $0x10] sm:$0xff] %vm407_vm9, %v402_v27  ;;  %v456_v28 = vld [vmem:[#allocation2 + $0x40] sm:$0xff] }
 0x166   : > { %411 = vst.msk [vmem:[#allocation2 + $0x10] sm:$0xff] %vm410_vm10, %v881_v16  ;;  %736 = vmatprep.subr.mxu1 %v456_v28  ;;  %v387_v30 = vpop.permute.xlu1 %386  ;;  %v451_v34 = vld [vmem:[#allocation2 + $0x18] sm:$0xff] }
 0x167   : > { %414 = vst.msk [vmem:[#allocation2 + $0x10] sm:$0xff] %vm413_vm11, %v881_v16  ;;  %737 = vmatpush3.msra.mxu1 %v456_v28 }
 0x168   : > { %738 = vmatprep.subr.mxu1 %v455_v29  ;;  %393 = vst.msk [vmem:[#allocation2] sm:$0xff] %vm392_vm12, %v387_v30 }
 0x169   : > { %739 = vmatpush3.msra.mxu1 %v455_v29  ;;  %396 = vst.msk [vmem:[#allocation2] sm:$0xff] %vm395_vm13, %v881_v16 }
 0x16a   : > { %v454_v31 = vld [vmem:[#allocation2 + $0x30] sm:$0xff]  ;;  %399 = vst.msk [vmem:[#allocation2] sm:$0xff] %vm398_vm14, %v881_v16 }
 0x16b   : > { %740 = vmatprep.subr.mxu1 %v454_v31  ;;  %v449_v36 = vld [vmem:[#allocation2 + $0x8] sm:$0xff]  ;;  %v461_v42 = vpop.permute.xlu0 %460 }
 0x16c   : > { %741 = vmatpush3.msra.mxu1 %v454_v31 }
 0x16d   : > { %742 = vmatprep.subr.mxu1 %v453_v32 }
 0x16e   : > { %743 = vmatpush3.msra.mxu1 %v453_v32  ;;  %v450_v35 = vld [vmem:[#allocation2 + $0x10] sm:$0xff] }
 0x16f   : > { %744 = vmatprep.subr.mxu1 %v452_v33 }
 0x170   : > { %745 = vmatpush3.msra.mxu1 %v452_v33 }
 0x171   : > { %746 = vmatprep.subr.mxu1 %v451_v34  ;;  %v448_v37 = vld [vmem:[#allocation2] sm:$0xff] }
 0x172   : > { %747 = vmatpush3.msra.mxu1 %v451_v34 }
 0x173   : > { %748 = vmatprep.subr.mxu1 %v450_v35  ;;  %v466_v39 = vpop.permute.xlu1 %465 }
 0x174   : > { %749 = vmatpush3.msra.mxu1 %v450_v35 }
 0x175   : > { %750 = vmatprep.subr.mxu1 %v449_v36 }
 0x176   : > { %751 = vmatpush3.msra.mxu1 %v449_v36 }
 0x177   : > { %752 = vmatprep.subr.mxu1 %v448_v37 }
 0x178   : > { %753 = vmatpush3.msra.mxu1 %v448_v37 }
 0x179   : > { %755 = vmatmul.mubr.msk.f32.vlgmr.msra.gmra.mxu1 %vm468_vm4, %v447_v38 }
 0x239   : > { %v756_v40 = vpop.f32.mrf.mxu1 }
 0x23a   : > { %v547_v41 = vadd.f32 %v756_v40, %v466_v39 }
 0x23b   : > { %v541_v43 = vpop.f32.mrf.mxu1 }
 0x23c   : > { %v551_v44 = vmax.f32 %v547_v41, 0.0  ;;  %v542_v45 = vadd.f32 %v541_v43, %v461_v42 }
 0x23e   : > { %v550_v46 = vmax.f32 %v542_v45, 0.0  ;;  %v555_v47 = vsel %vm416_vm2, %v551_v44, 0.0  ;;  %v559_v51 = vmul.f32 %v551_v44, %v551_v44 }
 0x23f   : > { %556 = vadd.xlane.f32.xlu1 %v555_v47 }
 0x240   : > { %v552_v48 = vsel %vm416_vm2, %v550_v46, 0.0  ;;  %v558_v49 = vmul.f32 %v550_v46, %v550_v46  ;;  %v563_v52 = vsel %vm416_vm2, %v559_v51, 0.0 }
 0x241   : > { %553 = vadd.xlane.f32.xlu0 %v552_v48 }
 0x242   : > { %v560_v50 = vsel %vm416_vm2, %v558_v49, 0.0 }
 0x245   : > { %561 = vadd.xlane.f32.xlu0 %v560_v50 }
 0x249   : > { %564 = vadd.xlane.f32.xlu0 %v563_v52 }
 0x2c8   : > { %v557_v53 = vpop.xlane.xlu1 %556 }
 0x2c9   : > { %v567_v55 = vsel %vm410_vm10, %v557_v53, 0.0 }
 0x2ca   : > { %v554_v54 = vpop.xlane.xlu0 %553 }
 0x2cb   : > { %v566_v56 = vsel %vm410_vm10, %v554_v54, 0.0 }
 0x2cc   : > { %v568_v57 = vadd.f32 %v567_v55, %v566_v56 }
 0x2ce   : > { %569 = vadd.xlane.f32.xlu1 %v568_v57  ;;  %v562_v58 = vpop.xlane.xlu0 %561 }
 0x2cf   : > { %v579_v60 = vsel %vm410_vm10, %v562_v58, 0.0 }
 0x2d2   : > { %v565_v59 = vpop.xlane.xlu0 %564 }
 0x2d3   : > { %v580_v61 = vsel %vm410_vm10, %v565_v59, 0.0 }
 0x2d4   : > { %v581_v62 = vadd.f32 %v580_v61, %v579_v60 }
 0x2d6   : > { %582 = vadd.xlane.f32.xlu0 %v581_v62 }
 0x357   : > { %v570_v63 = vpop.xlane.xlu1 %569 }
 0x358   : > { %v571_v0 = vrot.slane %v570_v63, 4 }
 0x35a   : > { %v572_v1 = vadd.f32 %v571_v0, %v570_v63 }
 0x35c   : > { %v573_v2 = vrot.slane %v572_v1, 2 }
 0x35e   : > { %v574_v3 = vadd.f32 %v573_v2, %v572_v1 }
 0x35f   : > { %v583_v4 = vpop.xlane.xlu0 %582 }
 0x360   : > { %v584_v5 = vrot.slane %v583_v4, 4  ;;  %v575_v6 = vrot.slane %v574_v3, 1 }
 0x362   : > { %v585_v7 = vadd.f32 %v584_v5, %v583_v4  ;;  %v576_v8 = vadd.f32 %v575_v6, %v574_v3 }
 0x364   : > { %v586_v9 = vrot.slane %v585_v7, 2  ;;  %758 = vpush %v576_v8 }
 0x366   : > { %v587_v10 = vadd.f32 %v586_v9, %v585_v7 }
 0x368   : > { %v588_v11 = vrot.slane %v587_v10, 1 }
 0x36a   : > { %v589_v12 = vadd.f32 %v588_v11, %v587_v10 }
 0x36c   : > { %760 = vpush %v589_v12 }
 0x395   : > { %s759_s29 = spop %758 }
 0x396   : > { %s578_s8 = smul.f32 0.00390625, %s759_s29  ;;  %s885_s29 = smov [#allocation3]  }
 0x398   : > { %s592_s9 = smul.f32 %s578_s8, %s578_s8  ;;  %v599_v15 = vstv %s578_s8 }
 0x399   : > { %v600_v16 = vsub.f32 %v550_v46, %v599_v15  ;;  %v601_v17 = vsub.f32 %v551_v44, %v599_v15 }
 0x39d   : > { %s761_s13 = spop %760 }
 0x39e   : > { %s591_s14 = smul.f32 0.00390625, %s761_s13  ;;  %s707_s13 = sshll.u32 %s949_s28, 8 }
 0x39f   : > { %s1066_s23 = scalar_lea.hbm %s1119_s7, %s707_s13  ;;  %s1072_s28 = scalar_lea.sflag [#allocation4], %s269_s19 }
 0x3a0   : > { %s593_s15 = ssub.f32 %s591_s14, %s592_s9  ;;  %s271_s14 = scalar_lea.vmem [#allocation3], %s695_s20 }
 0x3a1   : > { %s820_s9 = sshll.u32 %s885_s29, 4  ;;  %s821_s9 = int_to_ptr.vmem [resolvable:$false] %s820_s9 }
 0x3a2   : > { %s594_s17 = smax.f32 %s884_s16, %s593_s15  ;;  %s629_s15 = sshll.u32 %s271_s14, 4  ;;  %s1068_s15 = int_to_ptr.vmem [resolvable:$true] %s629_s15 }
 0x3a3   : > { %s595_s18 = sadd.f32 1e-05, %s594_s17  ;;  %s816_s20 = scalar_lea.vmem %s1068_s15, 256 }
 0x3a4   : > { %p817_p11 = scmp.ne.s32.totalorder %s1068_s15, %s816_s20  ;;  %s822_s13 = scalar_lea.vmem %s821_s9, 512 }
 0x3a5   : > { %v596_v13 = vstv %s595_s18  ;;  %p823_p0 = scmp.lt.s32.totalorder %s1068_s15, %s821_s9  ;;  %p824_p1 = scmp.lt.s32.totalorder %s822_s13, %s816_s20 }
 0x3a6   : > { %814 = vrsqrt.f32 %v596_v13  ;;  %p818_p12 = pnand %p817_p11, %p966_p5 }
 0x3a7   : > { %p825_p2 = por %p824_p1, %p823_p0 }
 0x3a8   : > { %p819_p13 = pneg %p818_p12 }
 0x3aa   : > { %p826_p3 = pnand %p825_p2, %p819_p13 }
 0x3b3   : > { %v815_v14 = vpop.eup %814 }
 0x3b4   : > { %762 = vpush %v815_v14 }
 0x3e5   : > { %s763_s21 = spop %762 }
 0x3e6   : > { %v602_v18 = vstv %s763_s21 }
 0x3e7   : > { %v603_v21 = vmul.f32 %v602_v18, %v600_v16  ;;  %v604_v22 = vmul.f32 %v602_v18, %v601_v17 }
 0x3e9   : > { %v607_v25 = vmul.f32 %v605_v19, %v603_v21  ;;  %v608_v26 = vmul.f32 %v606_v20, %v604_v22 }
 0x3eb   : > { %v611_v27 = vadd.f32 %v609_v23, %v607_v25  ;;  %v612_v28 = vadd.f32 %v610_v24, %v608_v26 }
 0x3ed   : > { %613 = vst.msk [vmem:[%s271_s14] sm:$0xff] %vm416_vm2, %v611_v27  ;;  %614 = vst.msk [vmem:[%s271_s14 + $0x8] sm:$0xff] %vm416_vm2, %v612_v28 }
 0x3ee   : > { %829 = shalt.err (!%p826_p3)
}
 0x3ef   : > { %s830_s19 = scalar_lea.hbm %s1066_s23, 256  ;;  %s834_s8 = scalar_lea.hbm %s1119_s7, 512 }
 0x3f0   : > { %p831_p4 = scmp.ne.s32.totalorder %s1066_s23, %s830_s19  ;;  %p835_p9 = scmp.lt.s32.totalorder %s1066_s23, %s1119_s7 }
 0x3f1   : > { %p836_p10 = scmp.lt.s32.totalorder %s834_s8, %s830_s19 }
 0x3f2   : > { %p832_p7 = pnand %p831_p4, %p966_p5 }
 0x3f3   : > { %p837_p11 = por %p836_p10, %p835_p9 }
 0x3f4   : > { %p833_p8 = pneg %p832_p7 }
 0x3f6   : > { %p838_p12 = pnand %p837_p11, %p833_p8 }
 0x3f8   : > { %841 = shalt.err (!%p838_p12)
}
 0x3f9   : > { %s886_s21 = smov 128   ;;  %s887_s22 = smov 8  }
 0x3fa   : > { %764 = dma.vmem_to_hbm [thread:$0]  (%p966_p5), %s1068_s15, 256, %s1066_s23, %s1072_s28, %s886_s21, %s886_s21, %s887_s22  }
 0x3fb PF: > { %p770_p13 = scmp.ge.s32.totalorder %s876_s27, 2  ;;  %s644_s20 = sand.u32 1, %s864_s24  }
 0x3fc   : > { %s645_s29 = scalar_lea.sflag [#allocation4], %s644_s20 }
 0x3fd   : > { %p767_p0 = pnand %p770_p13, %p970_p6 }
 0x3ff   : > { %p768_p1 = pneg %p767_p0 }
 0x401   : > { %859 = dma.done.wait (%p768_p1), %s645_s29, 256  }
 0x402   : > { %861 = vsyncadd (%p768_p1), %s645_s29, 4294967040  ;;  %p17_p2 = scmp.ge.s32.totalorder %s953_s30, 4   ;;  %s1122_s24 = smov %s868_s25 }
 0x403   : > { %s1123_s25 = smov %s872_s26  ;;  %s1124_s26 = smov %s964_s10 }
 0x404   : > { %s1125_s27 = smov %s953_s30  ;;  %19 = sbr.rel (!%p17_p2) target bundleno = 3 (0x3), region = 83 }
 0x409   :  { %650 = vsyncpa [#allocation4], 1 }
 0x40a   :  { %652 = vsyncpa [#allocation4 + $0x1], 1 }

</bundles_post_ra>
